<compile_context>
chip_gen: v5e
topology: v5e:2x2
jax: 0.10.0
libtpu: 0.0.40
codegen_flags: <defaults>
</compile_context>

<pallas_src>
import numpy as np
import jax
import jax.numpy as jnp
from jax.experimental import pallas as pl
from jax.experimental.pallas import tpu as pltpu

C = 3                  # image channels
IMG = 96               # image spatial size (H == W)
CROP = 32              # embedding_transformer resize target
D = C * CROP * CROP    # flattened crop feature size = 3072
H1 = 128               # embedding_net hidden width
EMB = 64               # final embedding width
EMB_PAD = 128          # lane-dense padded output width (sliced back to EMB)
B_MAX = 16             # STATIC batch (bf16 sublane tile); chunked if exceeded
THRESHOLD = 0.5
COCO_CLASSES = (1, 3, 17)


# ----------------------------------------------------------------------------
# Pallas kernel: fused (Linear -> ReLU -> Linear) embedding net.
# Per-channel normalization is folded into (w1, b1) offline; weights and the
# activation LHS are bf16, accumulation is f32 on the MXU.
# ----------------------------------------------------------------------------
def _embed_kernel(x_ref, w1_ref, b1_ref, w2_ref, b2_ref, o_ref):
    h = jnp.dot(x_ref[...], w1_ref[...],
                preferred_element_type=jnp.float32)            # (B, H1) f32
    h = jnp.maximum(h + b1_ref[...], 0.0)
    o_ref[...] = (jnp.dot(h.astype(jnp.bfloat16), w2_ref[...],
                          preferred_element_type=jnp.float32)
                  + b2_ref[...])                               # (B, EMB_PAD)


# Built once at import time: every shape is static, so this (and the jit
# below) compiles exactly once for the whole run.
_embed_call = pl.pallas_call(
    _embed_kernel,
    out_shape=jax.ShapeDtypeStruct((B_MAX, EMB_PAD), jnp.float32),
    grid_spec=pltpu.PrefetchScalarGridSpec(
        num_scalar_prefetch=0,
        grid=(1,),
        in_specs=[
            pl.BlockSpec((B_MAX, D), lambda i: (0, 0)),        # crops (bf16)
            pl.BlockSpec((D, H1), lambda i: (0, 0)),           # W1 (bf16)
            pl.BlockSpec((1, H1), lambda i: (0, 0)),           # b1 (f32)
            pl.BlockSpec((H1, EMB_PAD), lambda i: (0, 0)),     # W2 (bf16)
            pl.BlockSpec((1, EMB_PAD), lambda i: (0, 0)),      # b2 (f32)
        ],
        out_specs=pl.BlockSpec((B_MAX, EMB_PAD), lambda i: (0, 0)),
    ),
    compiler_params=pltpu.CompilerParams(
        dimension_semantics=("arbitrary",)),
)


@jax.jit
def _gather_and_embed(x_img, idx_table, w1, b1, w2, b2):
    """One fused dispatch: batched crop/NN-resize gather (static (B_MAX, D)
    index table), bf16 cast, Pallas embedding kernel, static column slice."""
    x_flat = jnp.take(x_img.reshape(-1), idx_table, axis=0)     # (B_MAX, D)
    x_flat = x_flat.astype(jnp.bfloat16)
    emb_full = _embed_call(x_flat, w1, b1, w2, b2)               # (B_MAX, 128)
    return emb_full[:, :EMB]                                     # (B_MAX, 64)


# ----------------------------------------------------------------------------
# embedding_transformer, expressed as a flat index table:
# crop [:, y1:y2, x1:x2] + nearest-neighbor resize to (C, CROP, CROP),
# flattened row-major to D indices into x.reshape(-1).
# TODO(synk): matches torch 'nearest' (floor); 'nearest-exact'/antialiased
#             Resize would need a different index formula.
# ----------------------------------------------------------------------------
def _crop_flat_indices(y1, y2, x1, x2):
    h = y2 - y1
    w = x2 - x1
    ry = (y1 + np.arange(CROP) * h // CROP).astype(np.int32)
    rx = (x1 + np.arange(CROP) * w // CROP).astype(np.int32)
    idx = (np.arange(C, dtype=np.int32)[:, None, None] * (IMG * IMG)
           + ry[None, :, None] * IMG
           + rx[None, None, :])
    return idx.reshape(D)


# ----------------------------------------------------------------------------
# detector stub
# ----------------------------------------------------------------------------
def synthetic_detector(x):
    # TODO(synk): a real detector (Faster R-CNN style) has no clean Pallas
    # equivalent; replaced with a deterministic stub producing score-sorted
    # boxes / scores / labels exactly in the format the forward pass consumes.
    boxes = np.array([
        [4.0, 4.0, 68.0, 60.0],    # kept (class 1, big enough)
        [10.0, 10.0, 90.0, 80.0],  # kept (class 3, big enough)
        [2.0, 2.0, 30.0, 20.0],    # skipped: both sides < 50
        [5.0, 5.0, 70.0, 70.0],    # skipped: class 7 not in coco_classes
        [0.0, 0.0, 50.0, 50.0],    # score below threshold -> loop terminates
    ], dtype=np.float32)
    scores = np.array([0.95, 0.90, 0.80, 0.70, 0.20], dtype=np.float32)
    labels = np.array([1, 3, 1, 7, 1], dtype=np.int32)
    return [{'boxes': boxes, 'scores': scores, 'labels': labels}]


# ----------------------------------------------------------------------------
# EmbeddingExtractor (mirrors the PyTorch forward semantics)
# ----------------------------------------------------------------------------
class EmbeddingExtractor:
    def __init__(self, detector, params, coco_classes, threshold):
        self.detector = detector
        self.params = params
        self.coco_classes = coco_classes
        self.threshold = threshold

    def forward(self, x):
        preds = self.detector(x)
        boxes = preds[0]['boxes']
        scores = preds[0]['scores']
        classes = preds[0]['labels']
        # Host-side data-dependent while loop, like the .item()-driven loop in
        # the PyTorch module.  Crop/resize is encoded as a flat index row per
        # kept detection (pure numpy); the device sees ONE fused jit dispatch.
        n_det = len(scores)
        is_done = False
        indx = 0
        idx_rows = []
        while not is_done:
            if indx >= n_det:      # guard: don't walk off the detections array
                break
            if scores[indx] > self.threshold:
                if int(classes[indx]) in self.coco_classes:
                    x1 = int(boxes[indx, 0])
                    y1 = int(boxes[indx, 1])
                    x2 = int(boxes[indx, 2])
                    y2 = int(boxes[indx, 3])
                    if x2 - x1 < 50 and y2 - y1 < 50:
                        indx = indx + 1
                        continue
                    idx_rows.append(_crop_flat_indices(y1, y2, x1, x2))
                indx = indx + 1
            else:
                is_done = True
        tb_len = len(idx_rows)
        if tb_len != 0:
            p = self.params
            out_chunks = []
            # Fixed-shape chunks of B_MAX rows -> no recompiles, ever.  Padded
            # rows gather pixel 0 and are sliced off before returning.
            for start in range(0, tb_len, B_MAX):
                chunk = idx_rows[start:start + B_MAX]
                idx_all = np.zeros((B_MAX, D), dtype=np.int32)
                idx_all[:len(chunk)] = np.stack(chunk)
                emb = _gather_and_embed(x, jnp.asarray(idx_all),
                                        p['w1'], p['b1'], p['w2'], p['b2'])
                out_chunks.append(emb[:len(chunk)])
            if len(out_chunks) == 1:
                return out_chunks[0]
            return jnp.concatenate(out_chunks, axis=0)
        return None


def init_params(key):
    k1, k2 = jax.random.split(key, 2)
    # Per-channel normalization constants expanded to the flattened layout.
    ch_mean = np.array([0.485, 0.456, 0.406], dtype=np.float32)
    ch_std = np.array([0.229, 0.224, 0.225], dtype=np.float32)
    mean = np.repeat(ch_mean, CROP * CROP)                      # (D,)
    std = np.repeat(ch_std, CROP * CROP)                        # (D,)
    w1 = np.asarray(jax.random.normal(k1, (D, H1), jnp.float32)) / np.sqrt(D)
    b1 = np.zeros((H1,), np.float32)
    w2 = np.asarray(jax.random.normal(k2, (H1, EMB), jnp.float32)) / np.sqrt(H1)
    b2 = np.zeros((EMB,), np.float32)
    # Fold (x - mean)/std into the first layer (offline, exact in f32).
    w1_folded = w1 / std[:, None]
    b1_folded = b1 - (mean / std) @ w1
    # Lane-dense padded second layer (extra columns are zero, sliced off).
    w2_pad = np.zeros((H1, EMB_PAD), np.float32)
    w2_pad[:, :EMB] = w2
    b2_pad = np.zeros((1, EMB_PAD), np.float32)
    b2_pad[0, :EMB] = b2
    # NOTE: W1 is bf16 *after* folding 1/std; if tighter agreement with an f32
    # reference is needed, store w1 as f32 (only ~0.6 us extra DMA).
    return {
        'w1': jnp.asarray(w1_folded, jnp.bfloat16),      # (D, H1) bf16
        'b1': jnp.asarray(b1_folded.reshape(1, H1)),     # (1, H1) f32
        'w2': jnp.asarray(w2_pad, jnp.bfloat16),         # (H1, 128) bf16
        'b2': jnp.asarray(b2_pad),                       # (1, 128) f32
    }


if __name__ == "__main__":
    key = jax.random.PRNGKey(0)
    k_img, k_par = jax.random.split(key)
    x = jax.random.uniform(k_img, (C, IMG, IMG), dtype=jnp.float32)  # CHW image
    params = init_params(k_par)

    extractor = EmbeddingExtractor(synthetic_detector, params,
                                   COCO_CLASSES, THRESHOLD)
    emb = extractor.forward(x)
    assert emb is not None
    emb = jax.block_until_ready(emb)
    assert emb.shape == (2, EMB) and emb.dtype == jnp.float32
    assert bool(jnp.all(jnp.isfinite(emb)))
    print("KERNEL_OK")
</pallas_src>

<mosaic_0001>
module attributes {stable_mosaic.version = 11 : i64} {
  func.func @_embed_kernel(%arg0: i32, %arg1: memref<16x3072xbf16, #tpu.memory_space<vmem>>, %arg2: memref<3072x128xbf16, #tpu.memory_space<vmem>>, %arg3: memref<1x128xf32, #tpu.memory_space<vmem>>, %arg4: memref<128x128xbf16, #tpu.memory_space<vmem>>, %arg5: memref<1x128xf32, #tpu.memory_space<vmem>>, %arg6: memref<16x128xf32, #tpu.memory_space<vmem>>) attributes {dimension_semantics = [#tpu.dimension_semantics<arbitrary>], iteration_bounds = array<i64: 1>, scalar_prefetch = 0 : i64, scratch_operands = 0 : i64, tpu.core_type = #tpu.core_type<tc>, window_params = [{pipeline_mode = #tpu.pipeline_mode<synchronous>, transform_indices = @transform_0, window_bounds = array<i64: 16, 3072>}, {pipeline_mode = #tpu.pipeline_mode<synchronous>, transform_indices = @transform_1, window_bounds = array<i64: 3072, 128>}, {pipeline_mode = #tpu.pipeline_mode<synchronous>, transform_indices = @transform_2, window_bounds = array<i64: 1, 128>}, {pipeline_mode = #tpu.pipeline_mode<synchronous>, transform_indices = @transform_3, window_bounds = array<i64: 128, 128>}, {pipeline_mode = #tpu.pipeline_mode<synchronous>, transform_indices = @transform_4, window_bounds = array<i64: 1, 128>}, {pipeline_mode = #tpu.pipeline_mode<synchronous>, transform_indices = @transform_5, window_bounds = array<i64: 16, 128>}]} {
    %c0 = arith.constant 0 : index
    %c0_0 = arith.constant 0 : index
    %0 = vector.load %arg1[%c0, %c0_0] : memref<16x3072xbf16, #tpu.memory_space<vmem>>, vector<16x3072xbf16>
    %c0_1 = arith.constant 0 : index
    %c0_2 = arith.constant 0 : index
    %1 = vector.load %arg2[%c0_1, %c0_2] : memref<3072x128xbf16, #tpu.memory_space<vmem>>, vector<3072x128xbf16>
    %cst = arith.constant dense<0.000000e+00> : vector<16x128xf32>
    %2 = tpu.matmul %0, %1, %cst {dimension_numbers = #tpu.dot_dimension_numbers<[1], [0], [0], [1], [0, 0, 1, 1], [], []>} : vector<16x3072xbf16>, vector<3072x128xbf16>, vector<16x128xf32> -> vector<16x128xf32>
    %c0_3 = arith.constant 0 : index
    %c0_4 = arith.constant 0 : index
    %3 = vector.load %arg3[%c0_3, %c0_4] : memref<1x128xf32, #tpu.memory_space<vmem>>, vector<1x128xf32>
    %4 = vector.broadcast %3 : vector<1x128xf32> to vector<16x128xf32>
    %5 = arith.addf %2, %4 : vector<16x128xf32>
    %cst_5 = arith.constant 0.000000e+00 : f32
    %6 = vector.broadcast %cst_5 : f32 to vector<16x128xf32>
    %7 = arith.maximumf %5, %6 : vector<16x128xf32>
    %8 = arith.truncf %7 : vector<16x128xf32> to vector<16x128xbf16>
    %c0_6 = arith.constant 0 : index
    %c0_7 = arith.constant 0 : index
    %9 = vector.load %arg4[%c0_6, %c0_7] : memref<128x128xbf16, #tpu.memory_space<vmem>>, vector<128x128xbf16>
    %cst_8 = arith.constant dense<0.000000e+00> : vector<16x128xf32>
    %10 = tpu.matmul %8, %9, %cst_8 {dimension_numbers = #tpu.dot_dimension_numbers<[1], [0], [0], [1], [0, 0, 1, 1], [], []>} : vector<16x128xbf16>, vector<128x128xbf16>, vector<16x128xf32> -> vector<16x128xf32>
    %c0_9 = arith.constant 0 : index
    %c0_10 = arith.constant 0 : index
    %11 = vector.load %arg5[%c0_9, %c0_10] : memref<1x128xf32, #tpu.memory_space<vmem>>, vector<1x128xf32>
    %12 = vector.broadcast %11 : vector<1x128xf32> to vector<16x128xf32>
    %13 = arith.addf %10, %12 : vector<16x128xf32>
    %c0_11 = arith.constant 0 : index
    %c0_12 = arith.constant 0 : index
    %14 = vector.load %arg6[%c0_11, %c0_12] : memref<16x128xf32, #tpu.memory_space<vmem>>, vector<16x128xf32>
    tpu.vector_store %arg6[%c0_11, %c0_12], %13 {strides = array<i32>} : memref<16x128xf32, #tpu.memory_space<vmem>>, vector<16x128xf32>,
    return
  }
  func.func @transform_0(%arg0: i32) -> (i32, i32) {
    %c0_i32 = arith.constant 0 : i32
    %c0_i32_0 = arith.constant 0 : i32
    %c0_i32_1 = arith.constant 0 : i32
    return %c0_i32, %c0_i32_0 : i32, i32
  }
  func.func @transform_1(%arg0: i32) -> (i32, i32) {
    %c0_i32 = arith.constant 0 : i32
    %c0_i32_0 = arith.constant 0 : i32
    %c0_i32_1 = arith.constant 0 : i32
    return %c0_i32, %c0_i32_0 : i32, i32
  }
  func.func @transform_2(%arg0: i32) -> (i32, i32) {
    %c0_i32 = arith.constant 0 : i32
    %c0_i32_0 = arith.constant 0 : i32
    %c0_i32_1 = arith.constant 0 : i32
    return %c0_i32, %c0_i32_0 : i32, i32
  }
  func.func @transform_3(%arg0: i32) -> (i32, i32) {
    %c0_i32 = arith.constant 0 : i32
    %c0_i32_0 = arith.constant 0 : i32
    %c0_i32_1 = arith.constant 0 : i32
    return %c0_i32, %c0_i32_0 : i32, i32
  }
  func.func @transform_4(%arg0: i32) -> (i32, i32) {
    %c0_i32 = arith.constant 0 : i32
    %c0_i32_0 = arith.constant 0 : i32
    %c0_i32_1 = arith.constant 0 : i32
    return %c0_i32, %c0_i32_0 : i32, i32
  }
  func.func @transform_5(%arg0: i32) -> (i32, i32) {
    %c0_i32 = arith.constant 0 : i32
    %c0_i32_0 = arith.constant 0 : i32
    %c0_i32_1 = arith.constant 0 : i32
    return %c0_i32, %c0_i32_0 : i32, i32
  }
}

</mosaic_0001>

<bundles_post_ra>
// kernel: _gather_and_embed.1
= control target key start
LH: loop header
LB: loop body
LE: loop exit
PB: predicated region body
PF: predicated region fallthrough
CT: control target
= control target key end

     0   :  { %s4083_s0 = inlined_call_operand.vmem [shape: bf16[16,3072], index: 0, kind: input, shape index: {}]   ;;  %s4084_s1 = inlined_call_operand.vmem [shape: bf16[3072,128], index: 1, kind: input, shape index: {}]   ;;  %s4085_s2 = inlined_call_operand.vmem [shape: f32[1,128], index: 2, kind: input, shape index: {}]   ;;  %s4086_s3 = inlined_call_operand.vmem [shape: bf16[128,128], index: 3, kind: input, shape index: {}]   ;;  %s4087_s4 = inlined_call_operand.vmem [shape: f32[1,128], index: 4, kind: input, shape index: {}]   ;;  %s4088_s5 = inlined_call_operand.hbm [shape: f32[16,128], index: 5, kind: output, shape index: {}]  }
   0x1   :  { %v3073_v0 = vld [vmem:[%s4084_s1 + $0x38] sm:$0xff]  ;;  %v3072_v4 = vld [vmem:[%s4084_s1 + $0x30] sm:$0xff]  ;;  %v3071_v8 = vld [vmem:[%s4084_s1 + $0x28] sm:$0xff] }
   0x2   :  { %v3081_v1 = vld [vmem:[%s4084_s1 + $0x78] sm:$0xff]  ;;  %1705 = vmatpush.bf16.msra.mxu0 %v3073_v0  ;;  %v3080_v5 = vld [vmem:[%s4084_s1 + $0x70] sm:$0xff]  ;;  %v3079_v9 = vld [vmem:[%s4084_s1 + $0x68] sm:$0xff] }
   0x3   :  { %v3089_v2 = vld [vmem:[%s4084_s1 + $0xb8] sm:$0xff]  ;;  %1719 = vmatpush.bf16.msra.mxu1 %v3081_v1  ;;  %v3088_v6 = vld [vmem:[%s4084_s1 + $0xb0] sm:$0xff]  ;;  %v3087_v10 = vld [vmem:[%s4084_s1 + $0xa8] sm:$0xff] }
   0x4   :  { %v3097_v3 = vld [vmem:[%s4084_s1 + $0xf8] sm:$0xff]  ;;  %1733 = vmatpush.bf16.msra.mxu2 %v3089_v2  ;;  %v3096_v7 = vld [vmem:[%s4084_s1 + $0xf0] sm:$0xff]  ;;  %v3095_v11 = vld [vmem:[%s4084_s1 + $0xe8] sm:$0xff] }
   0x5   :  { %1747 = vmatpush.bf16.msra.mxu3 %v3097_v3  ;;  %v3070_v12 = vld [vmem:[%s4084_s1 + $0x20] sm:$0xff]  ;;  %v3069_v16 = vld [vmem:[%s4084_s1 + $0x18] sm:$0xff]  ;;  %v3068_v20 = vld [vmem:[%s4084_s1 + $0x10] sm:$0xff] }
   0x6   :  { %1706 = vmatpush.bf16.msra.mxu0 %v3072_v4  ;;  %v3078_v13 = vld [vmem:[%s4084_s1 + $0x60] sm:$0xff]  ;;  %v3077_v17 = vld [vmem:[%s4084_s1 + $0x58] sm:$0xff]  ;;  %v3076_v21 = vld [vmem:[%s4084_s1 + $0x50] sm:$0xff] }
   0x7   :  { %1720 = vmatpush.bf16.msra.mxu1 %v3080_v5  ;;  %v3086_v14 = vld [vmem:[%s4084_s1 + $0xa0] sm:$0xff]  ;;  %v3085_v18 = vld [vmem:[%s4084_s1 + $0x98] sm:$0xff]  ;;  %v3084_v22 = vld [vmem:[%s4084_s1 + $0x90] sm:$0xff] }
   0x8   :  { %1734 = vmatpush.bf16.msra.mxu2 %v3088_v6  ;;  %v3094_v15 = vld [vmem:[%s4084_s1 + $0xe0] sm:$0xff]  ;;  %v3093_v19 = vld [vmem:[%s4084_s1 + $0xd8] sm:$0xff]  ;;  %v3092_v23 = vld [vmem:[%s4084_s1 + $0xd0] sm:$0xff] }
   0x9   :  { %1748 = vmatpush.bf16.msra.mxu3 %v3096_v7  ;;  %v3067_v24 = vld [vmem:[%s4084_s1 + $0x8] sm:$0xff] }
   0xa   :  { %1707 = vmatpush.bf16.msra.mxu0 %v3071_v8  ;;  %v3075_v25 = vld [vmem:[%s4084_s1 + $0x48] sm:$0xff] }
   0xb   :  { %1721 = vmatpush.bf16.msra.mxu1 %v3079_v9 }
   0xc   :  { %1735 = vmatpush.bf16.msra.mxu2 %v3087_v10 }
   0xd   :  { %1749 = vmatpush.bf16.msra.mxu3 %v3095_v11 }
   0xe   :  { %1708 = vmatpush.bf16.msra.mxu0 %v3070_v12 }
   0xf   :  { %1722 = vmatpush.bf16.msra.mxu1 %v3078_v13 }
  0x10   :  { %1736 = vmatpush.bf16.msra.mxu2 %v3086_v14 }
  0x11   :  { %1750 = vmatpush.bf16.msra.mxu3 %v3094_v15 }
  0x12   :  { %1709 = vmatpush.bf16.msra.mxu0 %v3069_v16 }
  0x13   :  { %1723 = vmatpush.bf16.msra.mxu1 %v3077_v17 }
  0x14   :  { %1737 = vmatpush.bf16.msra.mxu2 %v3085_v18 }
  0x15   :  { %1751 = vmatpush.bf16.msra.mxu3 %v3093_v19 }
  0x16   :  { %1710 = vmatpush.bf16.msra.mxu0 %v3068_v20 }
  0x17   :  { %1724 = vmatpush.bf16.msra.mxu1 %v3076_v21 }
  0x18   :  { %10 = vsyncpa [#allocation3], 0  ;;  %1738 = vmatpush.bf16.msra.mxu2 %v3084_v22  ;;  %v3083_v26 = vld [vmem:[%s4084_s1 + $0x88] sm:$0xff]  ;;  %v3066_v28 = vld [vmem:[%s4084_s1] sm:$0xff]  ;;  %s3297_s14 = smov [#allocation2]   ;;  %s2134_s17 = sshll.u32 %s4088_s5, 4  ;;  %s2135_s17 = int_to_ptr.hbm [resolvable:$true] %s2134_s17 }
  0x19   :  { %1752 = vmatpush.bf16.msra.mxu3 %v3092_v23  ;;  %v3091_v27 = vld [vmem:[%s4084_s1 + $0xc8] sm:$0xff]  ;;  %v3074_v29 = vld [vmem:[%s4084_s1 + $0x40] sm:$0xff]  ;;  %v3105_v32 = vld [vmem:[%s4084_s1 + $0x138] sm:$0xff]  ;;  %s2132_s15 = sshll.u32 %s3297_s14, 4  ;;  %s3298_s18 = smov 128   ;;  %s2133_s15 = int_to_ptr.vmem [resolvable:$true] %s2132_s15 }
  0x1a   :  { %v3082_v30 = vld [vmem:[%s4084_s1 + $0x80] sm:$0xff]  ;;  %1711 = vmatpush.bf16.msra.mxu0 %v3067_v24  ;;  %v3113_v33 = vld [vmem:[%s4084_s1 + $0x178] sm:$0xff]  ;;  %v2156_v36 = vld [vmem:[%s4083_s0 + $0x8] sm:$0xf]  ;;  %s3299_s19 = smov 8  }
  0x1b   :  { %v3090_v31 = vld [vmem:[%s4084_s1 + $0xc0] sm:$0xff]  ;;  %1725 = vmatpush.bf16.msra.mxu1 %v3075_v25  ;;  %v3055_v37 = vld [vmem:[%s4083_s0 + $0x64] sm:$0xf0]  ;;  %v3043_v40 = vld [vmem:[%s4083_s0 + $0xc] sm:$0xf] }
  0x1c   :  { %v2148_v34 = vld [vmem:[%s4083_s0] sm:$0xf]  ;;  %1739 = vmatpush.bf16.msra.mxu2 %v3083_v26  ;;  %v3042_v38 = vld [vmem:[%s4083_s0 + $0x4] sm:$0xf]  ;;  %v2158_v41 = vld [vmem:[%s4083_s0 + $0x68] sm:$0xf0]  ;;  %v2157_v45 = vor.u32 %v3055_v37, %v2156_v36 }
  0x1d   :  { %v3054_v35 = vld [vmem:[%s4083_s0 + $0x5c] sm:$0xf0]  ;;  %1753 = vmatpush.bf16.msra.mxu3 %v3091_v27  ;;  %v2150_v39 = vld [vmem:[%s4083_s0 + $0x60] sm:$0xf0]  ;;  %v3121_v42 = vld [vmem:[%s4084_s1 + $0x1b8] sm:$0xff]  ;;  %v2161_v47 = vor.u32 %v3043_v40, %v2158_v41 }
  0x1e   :  { %v3129_v43 = vld [vmem:[%s4084_s1 + $0x1f8] sm:$0xff]  ;;  %1712 = vmatpush.bf16.msra.mxu0 %v3066_v28  ;;  %v2149_v44 = vor.u32 %v3054_v35, %v2148_v34  ;;  %v2153_v46 = vor.u32 %v3042_v38, %v2150_v39  ;;  %v3104_v48 = vld [vmem:[%s4084_s1 + $0x130] sm:$0xff]  ;;  %v3103_v52 = vld [vmem:[%s4084_s1 + $0x128] sm:$0xff] }
  0x1f   :  { %1726 = vmatpush.bf16.msra.mxu1 %v3074_v29  ;;  %v3112_v49 = vld [vmem:[%s4084_s1 + $0x170] sm:$0xff]  ;;  %v3111_v53 = vld [vmem:[%s4084_s1 + $0x168] sm:$0xff]  ;;  %v3102_v56 = vld [vmem:[%s4084_s1 + $0x120] sm:$0xff] }
  0x20   :  { %1740 = vmatpush.bf16.msra.mxu2 %v3082_v30  ;;  %v3120_v50 = vld [vmem:[%s4084_s1 + $0x1b0] sm:$0xff]  ;;  %v3119_v54 = vld [vmem:[%s4084_s1 + $0x1a8] sm:$0xff]  ;;  %v3110_v57 = vld [vmem:[%s4084_s1 + $0x160] sm:$0xff] }
  0x21   :  { %1754 = vmatpush.bf16.msra.mxu3 %v3090_v31  ;;  %v3128_v51 = vld [vmem:[%s4084_s1 + $0x1f0] sm:$0xff]  ;;  %1713 = vmatmul.bf16.vlgmr.msra.gmra.mxu0 %v2149_v44  ;;  %v3127_v55 = vld [vmem:[%s4084_s1 + $0x1e8] sm:$0xff]  ;;  %v3118_v58 = vld [vmem:[%s4084_s1 + $0x1a0] sm:$0xff] }
  0x22   :  { %1761 = vmatpush.bf16.msrb.mxu0 %v3105_v32  ;;  %1727 = vmatmul.bf16.vlgmr.msra.gmra.mxu1 %v2153_v46  ;;  %v3126_v59 = vld [vmem:[%s4084_s1 + $0x1e0] sm:$0xff]  ;;  %v3101_v60 = vld [vmem:[%s4084_s1 + $0x118] sm:$0xff]  ;;  %v3100_v0 = vld [vmem:[%s4084_s1 + $0x110] sm:$0xff] }
  0x23   :  { %1775 = vmatpush.bf16.msrb.mxu1 %v3113_v33  ;;  %1741 = vmatmul.bf16.vlgmr.msra.gmra.mxu2 %v2157_v45  ;;  %v3109_v61 = vld [vmem:[%s4084_s1 + $0x158] sm:$0xff]  ;;  %v3108_v1 = vld [vmem:[%s4084_s1 + $0x150] sm:$0xff]  ;;  %v3099_v4 = vld [vmem:[%s4084_s1 + $0x108] sm:$0xff] }
  0x24   :  { %1789 = vmatpush.bf16.msrb.mxu2 %v3121_v42  ;;  %1755 = vmatmul.bf16.vlgmr.msra.gmra.mxu3 %v2161_v47  ;;  %v3117_v62 = vld [vmem:[%s4084_s1 + $0x198] sm:$0xff]  ;;  %v3116_v2 = vld [vmem:[%s4084_s1 + $0x190] sm:$0xff]  ;;  %v3107_v5 = vld [vmem:[%s4084_s1 + $0x148] sm:$0xff] }
  0x25   :  { %1803 = vmatpush.bf16.msrb.mxu3 %v3129_v43  ;;  %v3125_v63 = vld [vmem:[%s4084_s1 + $0x1d8] sm:$0xff]  ;;  %v3124_v3 = vld [vmem:[%s4084_s1 + $0x1d0] sm:$0xff]  ;;  %v3115_v6 = vld [vmem:[%s4084_s1 + $0x188] sm:$0xff] }
  0x26   :  { %1762 = vmatpush.bf16.msrb.mxu0 %v3104_v48  ;;  %v3123_v7 = vld [vmem:[%s4084_s1 + $0x1c8] sm:$0xff]  ;;  %v3098_v8 = vld [vmem:[%s4084_s1 + $0x100] sm:$0xff]  ;;  %v3137_v12 = vld [vmem:[%s4084_s1 + $0x238] sm:$0xff] }
  0x27   :  { %1776 = vmatpush.bf16.msrb.mxu1 %v3112_v49  ;;  %v3106_v9 = vld [vmem:[%s4084_s1 + $0x140] sm:$0xff]  ;;  %v3145_v13 = vld [vmem:[%s4084_s1 + $0x278] sm:$0xff]  ;;  %v2164_v14 = vld [vmem:[%s4083_s0 + $0x10] sm:$0xf] }
  0x28   :  { %1790 = vmatpush.bf16.msrb.mxu2 %v3120_v50  ;;  %v3114_v10 = vld [vmem:[%s4084_s1 + $0x180] sm:$0xff]  ;;  %v3056_v15 = vld [vmem:[%s4083_s0 + $0x6c] sm:$0xf0]  ;;  %v2172_v16 = vld [vmem:[%s4083_s0 + $0x18] sm:$0xf] }
  0x29   :  { %1804 = vmatpush.bf16.msrb.mxu3 %v3128_v51  ;;  %v3122_v11 = vld [vmem:[%s4084_s1 + $0x1c0] sm:$0xff]  ;;  %v3057_v17 = vld [vmem:[%s4083_s0 + $0x74] sm:$0xf0]  ;;  %v3044_v18 = vld [vmem:[%s4083_s0 + $0x14] sm:$0xf]  ;;  %v2165_v24 = vor.u32 %v3056_v15, %v2164_v14 }
  0x2a   :  { %1763 = vmatpush.bf16.msrb.mxu0 %v3103_v52  ;;  %v2166_v19 = vld [vmem:[%s4083_s0 + $0x70] sm:$0xf0]  ;;  %v3045_v20 = vld [vmem:[%s4083_s0 + $0x1c] sm:$0xf]  ;;  %v2173_v25 = vor.u32 %v3057_v17, %v2172_v16  ;;  %v3135_v32 = vld [vmem:[%s4084_s1 + $0x228] sm:$0xff] }
  0x2b   :  { %1777 = vmatpush.bf16.msrb.mxu1 %v3111_v53  ;;  %v2174_v21 = vld [vmem:[%s4083_s0 + $0x78] sm:$0xf0]  ;;  %v2169_v26 = vor.u32 %v3044_v18, %v2166_v19  ;;  %v3136_v28 = vld [vmem:[%s4084_s1 + $0x230] sm:$0xff]  ;;  %v3143_v33 = vld [vmem:[%s4084_s1 + $0x268] sm:$0xff] }
  0x2c   :  { %1791 = vmatpush.bf16.msrb.mxu2 %v3119_v54  ;;  %v3153_v22 = vld [vmem:[%s4084_s1 + $0x2b8] sm:$0xff]  ;;  %v2177_v27 = vor.u32 %v3045_v20, %v2174_v21  ;;  %v3144_v29 = vld [vmem:[%s4084_s1 + $0x270] sm:$0xff]  ;;  %v3151_v34 = vld [vmem:[%s4084_s1 + $0x2a8] sm:$0xff] }
  0x2d   :  { %1805 = vmatpush.bf16.msrb.mxu3 %v3127_v55  ;;  %v3161_v23 = vld [vmem:[%s4084_s1 + $0x2f8] sm:$0xff]  ;;  %v3152_v30 = vld [vmem:[%s4084_s1 + $0x2b0] sm:$0xff]  ;;  %v3159_v35 = vld [vmem:[%s4084_s1 + $0x2e8] sm:$0xff] }
  0x2e   :  { %1764 = vmatpush.bf16.msrb.mxu0 %v3102_v56  ;;  %v3160_v31 = vld [vmem:[%s4084_s1 + $0x2f0] sm:$0xff]  ;;  %v3134_v36 = vld [vmem:[%s4084_s1 + $0x220] sm:$0xff]  ;;  %v3133_v40 = vld [vmem:[%s4084_s1 + $0x218] sm:$0xff] }
  0x2f   :  { %1778 = vmatpush.bf16.msrb.mxu1 %v3110_v57  ;;  %v3142_v37 = vld [vmem:[%s4084_s1 + $0x260] sm:$0xff]  ;;  %v3141_v41 = vld [vmem:[%s4084_s1 + $0x258] sm:$0xff]  ;;  %v3132_v44 = vld [vmem:[%s4084_s1 + $0x210] sm:$0xff] }
  0x30   :  { %1792 = vmatpush.bf16.msrb.mxu2 %v3118_v58  ;;  %v3150_v38 = vld [vmem:[%s4084_s1 + $0x2a0] sm:$0xff]  ;;  %v3149_v42 = vld [vmem:[%s4084_s1 + $0x298] sm:$0xff]  ;;  %v3140_v45 = vld [vmem:[%s4084_s1 + $0x250] sm:$0xff] }
  0x31   :  { %1806 = vmatpush.bf16.msrb.mxu3 %v3126_v59  ;;  %v3158_v39 = vld [vmem:[%s4084_s1 + $0x2e0] sm:$0xff]  ;;  %v3157_v43 = vld [vmem:[%s4084_s1 + $0x2d8] sm:$0xff]  ;;  %v3148_v46 = vld [vmem:[%s4084_s1 + $0x290] sm:$0xff] }
  0x32   :  { %1765 = vmatpush.bf16.msrb.mxu0 %v3101_v60  ;;  %v3156_v47 = vld [vmem:[%s4084_s1 + $0x2d0] sm:$0xff]  ;;  %v3131_v48 = vld [vmem:[%s4084_s1 + $0x208] sm:$0xff]  ;;  %v3130_v52 = vld [vmem:[%s4084_s1 + $0x200] sm:$0xff] }
  0x33   :  { %1779 = vmatpush.bf16.msrb.mxu1 %v3109_v61  ;;  %v3139_v49 = vld [vmem:[%s4084_s1 + $0x248] sm:$0xff]  ;;  %v3138_v53 = vld [vmem:[%s4084_s1 + $0x240] sm:$0xff]  ;;  %v3169_v56 = vld [vmem:[%s4084_s1 + $0x338] sm:$0xff] }
  0x34   :  { %1793 = vmatpush.bf16.msrb.mxu2 %v3117_v62  ;;  %v3147_v50 = vld [vmem:[%s4084_s1 + $0x288] sm:$0xff]  ;;  %v3146_v54 = vld [vmem:[%s4084_s1 + $0x280] sm:$0xff]  ;;  %v3177_v57 = vld [vmem:[%s4084_s1 + $0x378] sm:$0xff] }
  0x35   :  { %1807 = vmatpush.bf16.msrb.mxu3 %v3125_v63  ;;  %v3155_v51 = vld [vmem:[%s4084_s1 + $0x2c8] sm:$0xff]  ;;  %v3154_v55 = vld [vmem:[%s4084_s1 + $0x2c0] sm:$0xff]  ;;  %v3165_v20 = vld [vmem:[%s4084_s1 + $0x318] sm:$0xff] }
  0x36   :  { %1766 = vmatpush.bf16.msrb.mxu0 %v3100_v0  ;;  %v2180_v58 = vld [vmem:[%s4083_s0 + $0x20] sm:$0xf]  ;;  %v2188_v60 = vld [vmem:[%s4083_s0 + $0x28] sm:$0xf]  ;;  %v3046_v62 = vld [vmem:[%s4083_s0 + $0x24] sm:$0xf] }
  0x37   :  { %1780 = vmatpush.bf16.msrb.mxu1 %v3108_v1  ;;  %v3058_v59 = vld [vmem:[%s4083_s0 + $0x7c] sm:$0xf0]  ;;  %v3059_v61 = vld [vmem:[%s4083_s0 + $0x84] sm:$0xf0]  ;;  %v2182_v63 = vld [vmem:[%s4083_s0 + $0x80] sm:$0xf0] }
  0x38   :  { %1794 = vmatpush.bf16.msrb.mxu2 %v3116_v2  ;;  %v3047_v0 = vld [vmem:[%s4083_s0 + $0x2c] sm:$0xf]  ;;  %v3185_v2 = vld [vmem:[%s4084_s1 + $0x3b8] sm:$0xff]  ;;  %v3166_v16 = vld [vmem:[%s4084_s1 + $0x320] sm:$0xff] }
  0x39   :  { %1808 = vmatpush.bf16.msrb.mxu3 %v3124_v3  ;;  %v2190_v1 = vld [vmem:[%s4083_s0 + $0x88] sm:$0xf0]  ;;  %v3193_v3 = vld [vmem:[%s4084_s1 + $0x3f8] sm:$0xff]  ;;  %v3174_v17 = vld [vmem:[%s4084_s1 + $0x360] sm:$0xff] }
  0x3a   :  { %1767 = vmatpush.bf16.msrb.mxu0 %v3099_v4  ;;  %v2181_v4 = vor.u32 %v3058_v59, %v2180_v58  ;;  %v3183_v14 = vld [vmem:[%s4084_s1 + $0x3a8] sm:$0xff]  ;;  %v3182_v18 = vld [vmem:[%s4084_s1 + $0x3a0] sm:$0xff]  ;;  %v3173_v21 = vld [vmem:[%s4084_s1 + $0x358] sm:$0xff] }
  0x3b   :  { %1781 = vmatpush.bf16.msrb.mxu1 %v3107_v5  ;;  %v2189_v5 = vor.u32 %v3059_v61, %v2188_v60  ;;  %v3191_v15 = vld [vmem:[%s4084_s1 + $0x3e8] sm:$0xff]  ;;  %v3190_v19 = vld [vmem:[%s4084_s1 + $0x3e0] sm:$0xff] }
  0x3c   :  { %1795 = vmatpush.bf16.msrb.mxu2 %v3115_v6  ;;  %v2185_v6 = vor.u32 %v3046_v62, %v2182_v63  ;;  %v3215_v58 = vld [vmem:[%s4084_s1 + $0x4a8] sm:$0xff]  ;;  %v3198_v60 = vld [vmem:[%s4084_s1 + $0x420] sm:$0xff] }
  0x3d   :  { %1809 = vmatpush.bf16.msrb.mxu3 %v3123_v7  ;;  %v2193_v7 = vor.u32 %v3047_v0, %v2190_v1  ;;  %v3223_v59 = vld [vmem:[%s4084_s1 + $0x4e8] sm:$0xff]  ;;  %v3206_v61 = vld [vmem:[%s4084_s1 + $0x460] sm:$0xff]  ;;  %v3197_v0 = vld [vmem:[%s4084_s1 + $0x418] sm:$0xff] }
  0x3e   :  { %1768 = vmatpush.bf16.msrb.mxu0 %v3098_v8  ;;  %v3168_v8 = vld [vmem:[%s4084_s1 + $0x330] sm:$0xff]  ;;  %v3214_v62 = vld [vmem:[%s4084_s1 + $0x4a0] sm:$0xff]  ;;  %v3205_v1 = vld [vmem:[%s4084_s1 + $0x458] sm:$0xff] }
  0x3f   :  { %1782 = vmatpush.bf16.msrb.mxu1 %v3106_v9  ;;  %v3176_v9 = vld [vmem:[%s4084_s1 + $0x370] sm:$0xff]  ;;  %v3222_v63 = vld [vmem:[%s4084_s1 + $0x4e0] sm:$0xff] }
  0x40   :  { %1796 = vmatpush.bf16.msrb.mxu2 %v3114_v10  ;;  %v3184_v10 = vld [vmem:[%s4084_s1 + $0x3b0] sm:$0xff] }
  0x41   :  { %1810 = vmatpush.bf16.msrb.mxu3 %v3122_v11  ;;  %1769 = vmatmul.bf16.vlgmr.msrb.gmra.mxu0 %v2165_v24  ;;  %v3192_v11 = vld [vmem:[%s4084_s1 + $0x3f0] sm:$0xff] }
  0x42   :  { %1817 = vmatpush.bf16.msra.mxu0 %v3137_v12  ;;  %1783 = vmatmul.bf16.vlgmr.msrb.gmra.mxu1 %v2169_v26  ;;  %v3167_v12 = vld [vmem:[%s4084_s1 + $0x328] sm:$0xff]  ;;  %v3164_v24 = vld [vmem:[%s4084_s1 + $0x310] sm:$0xff] }
  0x43   :  { %1831 = vmatpush.bf16.msra.mxu1 %v3145_v13  ;;  %1797 = vmatmul.bf16.vlgmr.msrb.gmra.mxu2 %v2173_v25  ;;  %v3175_v13 = vld [vmem:[%s4084_s1 + $0x368] sm:$0xff]  ;;  %v3172_v25 = vld [vmem:[%s4084_s1 + $0x350] sm:$0xff] }
  0x44   :  { %1845 = vmatpush.bf16.msra.mxu2 %v3153_v22  ;;  %1811 = vmatmul.bf16.vlgmr.msrb.gmra.mxu3 %v2177_v27  ;;  %v3181_v22 = vld [vmem:[%s4084_s1 + $0x398] sm:$0xff]  ;;  %v3180_v26 = vld [vmem:[%s4084_s1 + $0x390] sm:$0xff] }
  0x45   :  { %1859 = vmatpush.bf16.msra.mxu3 %v3161_v23  ;;  %v3189_v23 = vld [vmem:[%s4084_s1 + $0x3d8] sm:$0xff]  ;;  %v3188_v27 = vld [vmem:[%s4084_s1 + $0x3d0] sm:$0xff] }
  0x46   :  { %1818 = vmatpush.bf16.msra.mxu0 %v3136_v28  ;;  %v3163_v28 = vld [vmem:[%s4084_s1 + $0x308] sm:$0xff] }
  0x47   :  { %1832 = vmatpush.bf16.msra.mxu1 %v3144_v29  ;;  %v3171_v29 = vld [vmem:[%s4084_s1 + $0x348] sm:$0xff] }
  0x48   :  { %1846 = vmatpush.bf16.msra.mxu2 %v3152_v30  ;;  %v3179_v30 = vld [vmem:[%s4084_s1 + $0x388] sm:$0xff] }
  0x49   :  { %1860 = vmatpush.bf16.msra.mxu3 %v3160_v31  ;;  %v3187_v31 = vld [vmem:[%s4084_s1 + $0x3c8] sm:$0xff] }
  0x4a   :  { %1819 = vmatpush.bf16.msra.mxu0 %v3135_v32  ;;  %v3162_v32 = vld [vmem:[%s4084_s1 + $0x300] sm:$0xff] }
  0x4b   :  { %1833 = vmatpush.bf16.msra.mxu1 %v3143_v33  ;;  %v3170_v33 = vld [vmem:[%s4084_s1 + $0x340] sm:$0xff] }
  0x4c   :  { %1847 = vmatpush.bf16.msra.mxu2 %v3151_v34  ;;  %v3178_v34 = vld [vmem:[%s4084_s1 + $0x380] sm:$0xff] }
  0x4d   :  { %1861 = vmatpush.bf16.msra.mxu3 %v3159_v35  ;;  %v3186_v35 = vld [vmem:[%s4084_s1 + $0x3c0] sm:$0xff] }
  0x4e   :  { %1820 = vmatpush.bf16.msra.mxu0 %v3134_v36  ;;  %v3201_v36 = vld [vmem:[%s4084_s1 + $0x438] sm:$0xff] }
  0x4f   :  { %1834 = vmatpush.bf16.msra.mxu1 %v3142_v37  ;;  %v3209_v37 = vld [vmem:[%s4084_s1 + $0x478] sm:$0xff] }
  0x50   :  { %1848 = vmatpush.bf16.msra.mxu2 %v3150_v38  ;;  %v2196_v38 = vld [vmem:[%s4083_s0 + $0x30] sm:$0xf] }
  0x51   :  { %1862 = vmatpush.bf16.msra.mxu3 %v3158_v39  ;;  %v3060_v39 = vld [vmem:[%s4083_s0 + $0x8c] sm:$0xf0] }
  0x52   :  { %1821 = vmatpush.bf16.msra.mxu0 %v3133_v40  ;;  %v2204_v40 = vld [vmem:[%s4083_s0 + $0x38] sm:$0xf] }
  0x53   :  { %1835 = vmatpush.bf16.msra.mxu1 %v3141_v41  ;;  %v3061_v41 = vld [vmem:[%s4083_s0 + $0x94] sm:$0xf0] }
  0x54   :  { %1849 = vmatpush.bf16.msra.mxu2 %v3149_v42  ;;  %v3048_v42 = vld [vmem:[%s4083_s0 + $0x34] sm:$0xf] }
  0x55   :  { %1863 = vmatpush.bf16.msra.mxu3 %v3157_v43  ;;  %v2198_v43 = vld [vmem:[%s4083_s0 + $0x90] sm:$0xf0] }
  0x56   :  { %1822 = vmatpush.bf16.msra.mxu0 %v3132_v44  ;;  %v3049_v44 = vld [vmem:[%s4083_s0 + $0x3c] sm:$0xf] }
  0x57   :  { %1836 = vmatpush.bf16.msra.mxu1 %v3140_v45  ;;  %v2206_v45 = vld [vmem:[%s4083_s0 + $0x98] sm:$0xf0] }
  0x58   :  { %1850 = vmatpush.bf16.msra.mxu2 %v3148_v46  ;;  %v3217_v46 = vld [vmem:[%s4084_s1 + $0x4b8] sm:$0xff] }
  0x59   :  { %1864 = vmatpush.bf16.msra.mxu3 %v3156_v47  ;;  %v3225_v47 = vld [vmem:[%s4084_s1 + $0x4f8] sm:$0xff] }
  0x5a   :  { %1823 = vmatpush.bf16.msra.mxu0 %v3131_v48  ;;  %v2197_v48 = vor.u32 %v3060_v39, %v2196_v38  ;;  %v3247_v38 = vld [vmem:[%s4084_s1 + $0x5a8] sm:$0xff] }
  0x5b   :  { %1837 = vmatpush.bf16.msra.mxu1 %v3139_v49  ;;  %v2205_v49 = vor.u32 %v3061_v41, %v2204_v40  ;;  %v3255_v39 = vld [vmem:[%s4084_s1 + $0x5e8] sm:$0xff]  ;;  %v3230_v40 = vld [vmem:[%s4084_s1 + $0x520] sm:$0xff] }
  0x5c   :  { %1851 = vmatpush.bf16.msra.mxu2 %v3147_v50  ;;  %v2201_v50 = vor.u32 %v3048_v42, %v2198_v43  ;;  %v3238_v41 = vld [vmem:[%s4084_s1 + $0x560] sm:$0xff] }
  0x5d   :  { %1865 = vmatpush.bf16.msra.mxu3 %v3155_v51  ;;  %v2209_v51 = vor.u32 %v3049_v44, %v2206_v45  ;;  %v3246_v42 = vld [vmem:[%s4084_s1 + $0x5a0] sm:$0xff]  ;;  %v3229_v44 = vld [vmem:[%s4084_s1 + $0x518] sm:$0xff] }
  0x5e   :  { %1824 = vmatpush.bf16.msra.mxu0 %v3130_v52  ;;  %v3200_v52 = vld [vmem:[%s4084_s1 + $0x430] sm:$0xff]  ;;  %v3254_v43 = vld [vmem:[%s4084_s1 + $0x5e0] sm:$0xff]  ;;  %v3237_v45 = vld [vmem:[%s4084_s1 + $0x558] sm:$0xff] }
  0x5f   :  { %1838 = vmatpush.bf16.msra.mxu1 %v3138_v53  ;;  %v3208_v53 = vld [vmem:[%s4084_s1 + $0x470] sm:$0xff] }
  0x60   :  { %1852 = vmatpush.bf16.msra.mxu2 %v3146_v54  ;;  %v3216_v54 = vld [vmem:[%s4084_s1 + $0x4b0] sm:$0xff] }
  0x61   :  { %1866 = vmatpush.bf16.msra.mxu3 %v3154_v55  ;;  %1825 = vmatmul.bf16.vlgmr.msra.gmra.mxu0 %v2181_v4  ;;  %v3224_v55 = vld [vmem:[%s4084_s1 + $0x4f0] sm:$0xff] }
  0x62   :  { %1873 = vmatpush.bf16.msrb.mxu0 %v3169_v56  ;;  %1839 = vmatmul.bf16.vlgmr.msra.gmra.mxu1 %v2185_v6  ;;  %v3199_v56 = vld [vmem:[%s4084_s1 + $0x428] sm:$0xff]  ;;  %v3196_v4 = vld [vmem:[%s4084_s1 + $0x410] sm:$0xff] }
  0x63   :  { %1887 = vmatpush.bf16.msrb.mxu1 %v3177_v57  ;;  %1853 = vmatmul.bf16.vlgmr.msra.gmra.mxu2 %v2189_v5  ;;  %v3207_v57 = vld [vmem:[%s4084_s1 + $0x468] sm:$0xff]  ;;  %v3204_v5 = vld [vmem:[%s4084_s1 + $0x450] sm:$0xff] }
  0x64   :  { %1901 = vmatpush.bf16.msrb.mxu2 %v3185_v2  ;;  %1867 = vmatmul.bf16.vlgmr.msra.gmra.mxu3 %v2193_v7  ;;  %v3213_v2 = vld [vmem:[%s4084_s1 + $0x498] sm:$0xff]  ;;  %v3212_v6 = vld [vmem:[%s4084_s1 + $0x490] sm:$0xff] }
  0x65   :  { %1915 = vmatpush.bf16.msrb.mxu3 %v3193_v3  ;;  %v3221_v3 = vld [vmem:[%s4084_s1 + $0x4d8] sm:$0xff]  ;;  %v3220_v7 = vld [vmem:[%s4084_s1 + $0x4d0] sm:$0xff] }
  0x66   :  { %1874 = vmatpush.bf16.msrb.mxu0 %v3168_v8  ;;  %v3195_v8 = vld [vmem:[%s4084_s1 + $0x408] sm:$0xff] }
  0x67   :  { %1888 = vmatpush.bf16.msrb.mxu1 %v3176_v9  ;;  %v3203_v9 = vld [vmem:[%s4084_s1 + $0x448] sm:$0xff] }
  0x68   :  { %1902 = vmatpush.bf16.msrb.mxu2 %v3184_v10  ;;  %v3211_v10 = vld [vmem:[%s4084_s1 + $0x488] sm:$0xff] }
  0x69   :  { %1916 = vmatpush.bf16.msrb.mxu3 %v3192_v11  ;;  %v3219_v11 = vld [vmem:[%s4084_s1 + $0x4c8] sm:$0xff] }
  0x6a   :  { %1875 = vmatpush.bf16.msrb.mxu0 %v3167_v12  ;;  %v3194_v12 = vld [vmem:[%s4084_s1 + $0x400] sm:$0xff] }
  0x6b   :  { %1889 = vmatpush.bf16.msrb.mxu1 %v3175_v13  ;;  %v3202_v13 = vld [vmem:[%s4084_s1 + $0x440] sm:$0xff] }
  0x6c   :  { %1903 = vmatpush.bf16.msrb.mxu2 %v3183_v14  ;;  %v3210_v14 = vld [vmem:[%s4084_s1 + $0x480] sm:$0xff] }
  0x6d   :  { %1917 = vmatpush.bf16.msrb.mxu3 %v3191_v15  ;;  %v3218_v15 = vld [vmem:[%s4084_s1 + $0x4c0] sm:$0xff] }
  0x6e   :  { %1876 = vmatpush.bf16.msrb.mxu0 %v3166_v16  ;;  %v3233_v16 = vld [vmem:[%s4084_s1 + $0x538] sm:$0xff] }
  0x6f   :  { %1890 = vmatpush.bf16.msrb.mxu1 %v3174_v17  ;;  %v3241_v17 = vld [vmem:[%s4084_s1 + $0x578] sm:$0xff] }
  0x70   :  { %1904 = vmatpush.bf16.msrb.mxu2 %v3182_v18  ;;  %v2212_v18 = vld [vmem:[%s4083_s0 + $0x40] sm:$0xf] }
  0x71   :  { %1918 = vmatpush.bf16.msrb.mxu3 %v3190_v19  ;;  %v3062_v19 = vld [vmem:[%s4083_s0 + $0x9c] sm:$0xf0] }
  0x72   :  { %1877 = vmatpush.bf16.msrb.mxu0 %v3165_v20  ;;  %v2220_v20 = vld [vmem:[%s4083_s0 + $0x48] sm:$0xf] }
  0x73   :  { %1891 = vmatpush.bf16.msrb.mxu1 %v3173_v21  ;;  %v3063_v21 = vld [vmem:[%s4083_s0 + $0xa4] sm:$0xf0] }
  0x74   :  { %1905 = vmatpush.bf16.msrb.mxu2 %v3181_v22  ;;  %v3050_v22 = vld [vmem:[%s4083_s0 + $0x44] sm:$0xf] }
  0x75   :  { %1919 = vmatpush.bf16.msrb.mxu3 %v3189_v23  ;;  %v2214_v23 = vld [vmem:[%s4083_s0 + $0xa0] sm:$0xf0] }
  0x76   :  { %1878 = vmatpush.bf16.msrb.mxu0 %v3164_v24  ;;  %v3051_v24 = vld [vmem:[%s4083_s0 + $0x4c] sm:$0xf] }
  0x77   :  { %1892 = vmatpush.bf16.msrb.mxu1 %v3172_v25  ;;  %v2222_v25 = vld [vmem:[%s4083_s0 + $0xa8] sm:$0xf0] }
  0x78   :  { %1906 = vmatpush.bf16.msrb.mxu2 %v3180_v26  ;;  %v3249_v26 = vld [vmem:[%s4084_s1 + $0x5b8] sm:$0xff] }
  0x79   :  { %1920 = vmatpush.bf16.msrb.mxu3 %v3188_v27  ;;  %v3257_v27 = vld [vmem:[%s4084_s1 + $0x5f8] sm:$0xff] }
  0x7a   :  { %1879 = vmatpush.bf16.msrb.mxu0 %v3163_v28  ;;  %v2213_v28 = vor.u32 %v3062_v19, %v2212_v18 }
  0x7b   :  { %1893 = vmatpush.bf16.msrb.mxu1 %v3171_v29  ;;  %v2221_v29 = vor.u32 %v3063_v21, %v2220_v20  ;;  %v3269_v20 = vld [vmem:[%s4085_s2] ss:$0 sm:$0xff] }
  0x7c   :  { %1907 = vmatpush.bf16.msrb.mxu2 %v3179_v30  ;;  %v2217_v30 = vor.u32 %v3050_v22, %v2214_v23 }
  0x7d   :  { %1921 = vmatpush.bf16.msrb.mxu3 %v3187_v31  ;;  %v2225_v31 = vor.u32 %v3051_v24, %v2222_v25 }
  0x7e   :  { %1880 = vmatpush.bf16.msrb.mxu0 %v3162_v32  ;;  %v3232_v32 = vld [vmem:[%s4084_s1 + $0x530] sm:$0xff] }
  0x7f   :  { %1894 = vmatpush.bf16.msrb.mxu1 %v3170_v33  ;;  %v3240_v33 = vld [vmem:[%s4084_s1 + $0x570] sm:$0xff] }
  0x80   :  { %1908 = vmatpush.bf16.msrb.mxu2 %v3178_v34  ;;  %v3248_v34 = vld [vmem:[%s4084_s1 + $0x5b0] sm:$0xff] }
  0x81   :  { %1922 = vmatpush.bf16.msrb.mxu3 %v3186_v35  ;;  %1881 = vmatmul.bf16.vlgmr.msrb.gmra.mxu0 %v2197_v48  ;;  %v3256_v35 = vld [vmem:[%s4084_s1 + $0x5f0] sm:$0xff] }
  0x82   :  { %1929 = vmatpush.bf16.msra.mxu0 %v3201_v36  ;;  %1895 = vmatmul.bf16.vlgmr.msrb.gmra.mxu1 %v2201_v50  ;;  %v3231_v36 = vld [vmem:[%s4084_s1 + $0x528] sm:$0xff]  ;;  %v3228_v48 = vld [vmem:[%s4084_s1 + $0x510] sm:$0xff] }
  0x83   :  { %1943 = vmatpush.bf16.msra.mxu1 %v3209_v37  ;;  %1909 = vmatmul.bf16.vlgmr.msrb.gmra.mxu2 %v2205_v49  ;;  %v3239_v37 = vld [vmem:[%s4084_s1 + $0x568] sm:$0xff]  ;;  %v3236_v49 = vld [vmem:[%s4084_s1 + $0x550] sm:$0xff] }
  0x84   :  { %1957 = vmatpush.bf16.msra.mxu2 %v3217_v46  ;;  %1923 = vmatmul.bf16.vlgmr.msrb.gmra.mxu3 %v2209_v51  ;;  %v3245_v46 = vld [vmem:[%s4084_s1 + $0x598] sm:$0xff]  ;;  %v3244_v50 = vld [vmem:[%s4084_s1 + $0x590] sm:$0xff] }
  0x85   :  { %1971 = vmatpush.bf16.msra.mxu3 %v3225_v47  ;;  %v3253_v47 = vld [vmem:[%s4084_s1 + $0x5d8] sm:$0xff]  ;;  %v3252_v51 = vld [vmem:[%s4084_s1 + $0x5d0] sm:$0xff] }
  0x86   :  { %1930 = vmatpush.bf16.msra.mxu0 %v3200_v52  ;;  %v3227_v52 = vld [vmem:[%s4084_s1 + $0x508] sm:$0xff] }
  0x87   :  { %1944 = vmatpush.bf16.msra.mxu1 %v3208_v53  ;;  %v3235_v53 = vld [vmem:[%s4084_s1 + $0x548] sm:$0xff] }
  0x88   :  { %1958 = vmatpush.bf16.msra.mxu2 %v3216_v54  ;;  %v3243_v54 = vld [vmem:[%s4084_s1 + $0x588] sm:$0xff] }
  0x89   :  { %1972 = vmatpush.bf16.msra.mxu3 %v3224_v55  ;;  %v3251_v55 = vld [vmem:[%s4084_s1 + $0x5c8] sm:$0xff] }
  0x8a   :  { %1931 = vmatpush.bf16.msra.mxu0 %v3199_v56  ;;  %v3226_v56 = vld [vmem:[%s4084_s1 + $0x500] sm:$0xff] }
  0x8b   :  { %1945 = vmatpush.bf16.msra.mxu1 %v3207_v57  ;;  %v3234_v57 = vld [vmem:[%s4084_s1 + $0x540] sm:$0xff] }
  0x8c   :  { %1959 = vmatpush.bf16.msra.mxu2 %v3215_v58  ;;  %v3242_v58 = vld [vmem:[%s4084_s1 + $0x580] sm:$0xff] }
  0x8d   :  { %1973 = vmatpush.bf16.msra.mxu3 %v3223_v59  ;;  %v3250_v59 = vld [vmem:[%s4084_s1 + $0x5c0] sm:$0xff] }
  0x8e   :  { %1932 = vmatpush.bf16.msra.mxu0 %v3198_v60  ;;  %v2228_v60 = vld [vmem:[%s4083_s0 + $0x50] sm:$0xf] }
  0x8f   :  { %1946 = vmatpush.bf16.msra.mxu1 %v3206_v61  ;;  %v3064_v61 = vld [vmem:[%s4083_s0 + $0xac] sm:$0xf0] }
  0x90   :  { %1960 = vmatpush.bf16.msra.mxu2 %v3214_v62  ;;  %v3052_v62 = vld [vmem:[%s4083_s0 + $0x54] sm:$0xf] }
  0x91   :  { %1974 = vmatpush.bf16.msra.mxu3 %v3222_v63  ;;  %v2230_v63 = vld [vmem:[%s4083_s0 + $0xb0] sm:$0xf0] }
  0x92   :  { %1933 = vmatpush.bf16.msra.mxu0 %v3197_v0  ;;  %v2236_v0 = vld [vmem:[%s4083_s0 + $0x58] sm:$0xf] }
  0x93   :  { %1947 = vmatpush.bf16.msra.mxu1 %v3205_v1  ;;  %v3065_v1 = vld [vmem:[%s4083_s0 + $0xb4] sm:$0xf0] }
  0x94   :  { %1961 = vmatpush.bf16.msra.mxu2 %v3213_v2  ;;  %v3053_v2 = vld [vmem:[%s4083_s0 + $0x5c] sm:$0xf] }
  0x95   :  { %1975 = vmatpush.bf16.msra.mxu3 %v3221_v3  ;;  %v2238_v3 = vld [vmem:[%s4083_s0 + $0xb8] sm:$0xf0] }
  0x96   :  { %1934 = vmatpush.bf16.msra.mxu0 %v3196_v4  ;;  %v2229_v4 = vor.u32 %v3064_v61, %v2228_v60  ;;  %v3261_v61 = vld [vmem:[%s4086_s3 + $0x18] sm:$0xff] }
  0x97   :  { %1948 = vmatpush.bf16.msra.mxu1 %v3204_v5  ;;  %v2233_v5 = vor.u32 %v3052_v62, %v2230_v63 }
  0x98   :  { %1962 = vmatpush.bf16.msra.mxu2 %v3212_v6  ;;  %v2237_v6 = vor.u32 %v3065_v1, %v2236_v0  ;;  %v3260_v1 = vld [vmem:[%s4086_s3 + $0x10] sm:$0xff] }
  0x99   :  { %1976 = vmatpush.bf16.msra.mxu3 %v3220_v7  ;;  %v2241_v7 = vor.u32 %v3053_v2, %v2238_v3 }
  0x9a   :  { %1935 = vmatpush.bf16.msra.mxu0 %v3195_v8 }
  0x9b   :  { %1949 = vmatpush.bf16.msra.mxu1 %v3203_v9 }
  0x9c   :  { %1963 = vmatpush.bf16.msra.mxu2 %v3211_v10 }
  0x9d   :  { %1977 = vmatpush.bf16.msra.mxu3 %v3219_v11 }
  0x9e   :  { %1936 = vmatpush.bf16.msra.mxu0 %v3194_v12  ;;  %v1714_v8 = vpop.f32.mrf.mxu0 }
  0x9f   :  { %1950 = vmatpush.bf16.msra.mxu1 %v3202_v13  ;;  %v1728_v9 = vpop.f32.mrf.mxu1  ;;  %v1715_v22 = vadd.f32 %v3269_v20, %v1714_v8  ;;  %v3259_v8 = vld [vmem:[%s4086_s3 + $0x8] sm:$0xff] }
  0xa0   :  { %1964 = vmatpush.bf16.msra.mxu2 %v3210_v14 }
  0xa1   :  { %1978 = vmatpush.bf16.msra.mxu3 %v3218_v15  ;;  %1937 = vmatmul.bf16.vlgmr.msra.gmra.mxu0 %v2213_v28  ;;  %v1729_v24 = vadd.f32 %v1728_v9, %v1715_v22 }
  0xa2   :  { %1985 = vmatpush.bf16.msrb.mxu0 %v3233_v16  ;;  %1951 = vmatmul.bf16.vlgmr.msra.gmra.mxu1 %v2217_v30 }
  0xa3   :  { %1999 = vmatpush.bf16.msrb.mxu1 %v3241_v17  ;;  %1965 = vmatmul.bf16.vlgmr.msra.gmra.mxu2 %v2221_v29 }
  0xa4   :  { %2013 = vmatpush.bf16.msrb.mxu2 %v3249_v26  ;;  %1979 = vmatmul.bf16.vlgmr.msra.gmra.mxu3 %v2225_v31 }
  0xa5   :  { %2027 = vmatpush.bf16.msrb.mxu3 %v3257_v27 }
  0xa6   :  { %1986 = vmatpush.bf16.msrb.mxu0 %v3232_v32  ;;  %v1742_v10 = vpop.f32.mrf.mxu2  ;;  %v1716_v12 = vpop.f32.mrf.mxu0 }
  0xa7   :  { %2000 = vmatpush.bf16.msrb.mxu1 %v3240_v33  ;;  %v1756_v11 = vpop.f32.mrf.mxu3  ;;  %v1730_v13 = vpop.f32.mrf.mxu1  ;;  %v1717_v27 = vadd.f32 %v3269_v20, %v1716_v12  ;;  %v1743_v29 = vadd.f32 %v1742_v10, %v1729_v24 }
  0xa8   :  { %2014 = vmatpush.bf16.msrb.mxu2 %v3248_v34 }
  0xa9   :  { %2028 = vmatpush.bf16.msrb.mxu3 %v3256_v35  ;;  %v1731_v31 = vadd.f32 %v1730_v13, %v1717_v27  ;;  %v1757_v32 = vadd.f32 %v1756_v11, %v1743_v29  ;;  %v3258_v13 = vld [vmem:[%s4086_s3] sm:$0xff] }
  0xaa   :  { %1987 = vmatpush.bf16.msrb.mxu0 %v3231_v36 }
  0xab   :  { %2001 = vmatpush.bf16.msrb.mxu1 %v3239_v37 }
  0xac   :  { %2015 = vmatpush.bf16.msrb.mxu2 %v3247_v38  ;;  %v3265_v38 = vld [vmem:[%s4086_s3 + $0x38] sm:$0xff] }
  0xad   :  { %2029 = vmatpush.bf16.msrb.mxu3 %v3255_v39 }
  0xae   :  { %1988 = vmatpush.bf16.msrb.mxu0 %v3230_v40  ;;  %v1744_v14 = vpop.f32.mrf.mxu2  ;;  %v3264_v40 = vld [vmem:[%s4086_s3 + $0x30] sm:$0xff] }
  0xaf   :  { %2002 = vmatpush.bf16.msrb.mxu1 %v3238_v41  ;;  %v1758_v15 = vpop.f32.mrf.mxu3  ;;  %v1745_v35 = vadd.f32 %v1744_v14, %v1731_v31 }
  0xb0   :  { %2016 = vmatpush.bf16.msrb.mxu2 %v3246_v42 }
  0xb1   :  { %2030 = vmatpush.bf16.msrb.mxu3 %v3254_v43  ;;  %v1759_v39 = vadd.f32 %v1758_v15, %v1745_v35 }
  0xb2   :  { %1989 = vmatpush.bf16.msrb.mxu0 %v3229_v44 }
  0xb3   :  { %2003 = vmatpush.bf16.msrb.mxu1 %v3237_v45 }
  0xb4   :  { %2017 = vmatpush.bf16.msrb.mxu2 %v3245_v46 }
  0xb5   :  { %2031 = vmatpush.bf16.msrb.mxu3 %v3253_v47 }
  0xb6   :  { %1990 = vmatpush.bf16.msrb.mxu0 %v3228_v48 }
  0xb7   :  { %2004 = vmatpush.bf16.msrb.mxu1 %v3236_v49 }
  0xb8   :  { %2018 = vmatpush.bf16.msrb.mxu2 %v3244_v50  ;;  %v3263_v50 = vld [vmem:[%s4086_s3 + $0x28] sm:$0xff] }
  0xb9   :  { %2032 = vmatpush.bf16.msrb.mxu3 %v3252_v51 }
  0xba   :  { %1991 = vmatpush.bf16.msrb.mxu0 %v3227_v52 }
  0xbb   :  { %2005 = vmatpush.bf16.msrb.mxu1 %v3235_v53 }
  0xbc   :  { %2019 = vmatpush.bf16.msrb.mxu2 %v3243_v54 }
  0xbd   :  { %2033 = vmatpush.bf16.msrb.mxu3 %v3251_v55 }
  0xbe   :  { %1992 = vmatpush.bf16.msrb.mxu0 %v3226_v56  ;;  %v1770_v16 = vpop.f32.mrf.mxu0  ;;  %v3262_v56 = vld [vmem:[%s4086_s3 + $0x20] sm:$0xff] }
  0xbf   :  { %2006 = vmatpush.bf16.msrb.mxu1 %v3234_v57  ;;  %v1784_v17 = vpop.f32.mrf.mxu1  ;;  %v1771_v36 = vadd.f32 %v1770_v16, %v1757_v32 }
  0xc0   :  { %2020 = vmatpush.bf16.msrb.mxu2 %v3242_v58 }
  0xc1   :  { %2034 = vmatpush.bf16.msrb.mxu3 %v3250_v59  ;;  %1993 = vmatmul.bf16.vlgmr.msrb.gmra.mxu0 %v2229_v4  ;;  %v1785_v42 = vadd.f32 %v1784_v17, %v1771_v36 }
  0xc2   :  { %2007 = vmatmul.bf16.vlgmr.msrb.gmra.mxu1 %v2233_v5  ;;  %2112 = vmatpush.bf16.msra.mxu0 %v3265_v38 }
  0xc3   :  { %2021 = vmatmul.bf16.vlgmr.msrb.gmra.mxu2 %v2237_v6 }
  0xc4   :  { %2035 = vmatmul.bf16.vlgmr.msrb.gmra.mxu3 %v2241_v7 }
  0xc6   :  { %v1798_v18 = vpop.f32.mrf.mxu2  ;;  %v1772_v21 = vpop.f32.mrf.mxu0  ;;  %2113 = vmatpush.bf16.msra.mxu0 %v3264_v40 }
  0xc7   :  { %v1812_v19 = vpop.f32.mrf.mxu3  ;;  %v1786_v23 = vpop.f32.mrf.mxu1  ;;  %v1773_v43 = vadd.f32 %v1772_v21, %v1759_v39  ;;  %v1799_v46 = vadd.f32 %v1798_v18, %v1785_v42 }
  0xc9   :  { %v1787_v48 = vadd.f32 %v1786_v23, %v1773_v43  ;;  %v1813_v51 = vadd.f32 %v1812_v19, %v1799_v46 }
  0xca   :  { %2114 = vmatpush.bf16.msra.mxu0 %v3263_v50 }
  0xce   :  { %v1800_v25 = vpop.f32.mrf.mxu2  ;;  %2115 = vmatpush.bf16.msra.mxu0 %v3262_v56 }
  0xcf   :  { %v1814_v26 = vpop.f32.mrf.mxu3  ;;  %v1801_v52 = vadd.f32 %v1800_v25, %v1787_v48 }
  0xd1   :  { %v1815_v57 = vadd.f32 %v1814_v26, %v1801_v52  ;;  %v3270_v52 = vld [vmem:[%s4087_s4] ss:$0 sm:$0xff] }
  0xd2   :  { %2116 = vmatpush.bf16.msra.mxu0 %v3261_v61 }
  0xd6   :  { %2117 = vmatpush.bf16.msra.mxu0 %v3260_v1 }
  0xda   :  { %2118 = vmatpush.bf16.msra.mxu0 %v3259_v8 }
  0xde   :  { %v1826_v28 = vpop.f32.mrf.mxu0  ;;  %2119 = vmatpush.bf16.msra.mxu0 %v3258_v13 }
  0xdf   :  { %v1840_v30 = vpop.f32.mrf.mxu1  ;;  %v1827_v53 = vadd.f32 %v1826_v28, %v1813_v51 }
  0xe1   :  { %v1841_v58 = vadd.f32 %v1840_v30, %v1827_v53 }
  0xe6   :  { %v1854_v33 = vpop.f32.mrf.mxu2  ;;  %v1828_v37 = vpop.f32.mrf.mxu0 }
  0xe7   :  { %v1868_v34 = vpop.f32.mrf.mxu3  ;;  %v1842_v41 = vpop.f32.mrf.mxu1  ;;  %v1829_v59 = vadd.f32 %v1828_v37, %v1815_v57  ;;  %v1855_v62 = vadd.f32 %v1854_v33, %v1841_v58 }
  0xe9   :  { %v1843_v0 = vadd.f32 %v1842_v41, %v1829_v59  ;;  %v1869_v2 = vadd.f32 %v1868_v34, %v1855_v62 }
  0xee   :  { %v1856_v44 = vpop.f32.mrf.mxu2 }
  0xef   :  { %v1870_v45 = vpop.f32.mrf.mxu3  ;;  %v1857_v3 = vadd.f32 %v1856_v44, %v1843_v0 }
  0xf1   :  { %v1871_v9 = vadd.f32 %v1870_v45, %v1857_v3 }
  0xfe   :  { %v1882_v47 = vpop.f32.mrf.mxu0 }
  0xff   :  { %v1896_v49 = vpop.f32.mrf.mxu1  ;;  %v1883_v6 = vadd.f32 %v1882_v47, %v1869_v2 }
 0x101   :  { %v1897_v11 = vadd.f32 %v1896_v49, %v1883_v6 }
 0x106   :  { %v1910_v54 = vpop.f32.mrf.mxu2  ;;  %v1884_v60 = vpop.f32.mrf.mxu0 }
 0x107   :  { %v1924_v55 = vpop.f32.mrf.mxu3  ;;  %v1898_v63 = vpop.f32.mrf.mxu1  ;;  %v1885_v12 = vadd.f32 %v1884_v60, %v1871_v9  ;;  %v1911_v14 = vadd.f32 %v1910_v54, %v1897_v11 }
 0x109   :  { %v1899_v17 = vadd.f32 %v1898_v63, %v1885_v12  ;;  %v1925_v18 = vadd.f32 %v1924_v55, %v1911_v14 }
 0x10e   :  { %v1912_v4 = vpop.f32.mrf.mxu2 }
 0x10f   :  { %v1926_v5 = vpop.f32.mrf.mxu3  ;;  %v1913_v19 = vadd.f32 %v1912_v4, %v1899_v17 }
 0x111   :  { %v1927_v23 = vadd.f32 %v1926_v5, %v1913_v19 }
 0x11e   :  { %v1938_v7 = vpop.f32.mrf.mxu0 }
 0x11f   :  { %v1952_v10 = vpop.f32.mrf.mxu1  ;;  %v1939_v21 = vadd.f32 %v1938_v7, %v1925_v18 }
 0x121   :  { %v1953_v24 = vadd.f32 %v1952_v10, %v1939_v21 }
 0x126   :  { %v1966_v15 = vpop.f32.mrf.mxu2  ;;  %v1940_v20 = vpop.f32.mrf.mxu0 }
 0x127   :  { %v1980_v16 = vpop.f32.mrf.mxu3  ;;  %v1954_v22 = vpop.f32.mrf.mxu1  ;;  %v1941_v25 = vadd.f32 %v1940_v20, %v1927_v23  ;;  %v1967_v28 = vadd.f32 %v1966_v15, %v1953_v24 }
 0x129   :  { %v1955_v30 = vadd.f32 %v1954_v22, %v1941_v25  ;;  %v1981_v32 = vadd.f32 %v1980_v16, %v1967_v28 }
 0x12e   :  { %v1968_v26 = vpop.f32.mrf.mxu2 }
 0x12f   :  { %v1982_v27 = vpop.f32.mrf.mxu3  ;;  %v1969_v33 = vadd.f32 %v1968_v26, %v1955_v30 }
 0x131   :  { %v1983_v37 = vadd.f32 %v1982_v27, %v1969_v33 }
 0x13e   :  { %v1994_v29 = vpop.f32.mrf.mxu0 }
 0x13f   :  { %v2008_v31 = vpop.f32.mrf.mxu1  ;;  %v1995_v34 = vadd.f32 %v1994_v29, %v1981_v32 }
 0x141   :  { %v2009_v39 = vadd.f32 %v2008_v31, %v1995_v34 }
 0x146   :  { %v2022_v35 = vpop.f32.mrf.mxu2  ;;  %v1996_v38 = vpop.f32.mrf.mxu0 }
 0x147   :  { %v2036_v36 = vpop.f32.mrf.mxu3  ;;  %v1997_v40 = vadd.f32 %v1996_v38, %v1983_v37  ;;  %v2023_v41 = vadd.f32 %v2022_v35, %v2009_v39  ;;  %v2010_v42 = vpop.f32.mrf.mxu1 }
 0x149   :  { %v2011_v43 = vadd.f32 %v2010_v42, %v1997_v40  ;;  %v2037_v45 = vadd.f32 %v2036_v36, %v2023_v41 }
 0x14b   :  { %v2041_v49 = vmax.f32 %v2037_v45, 0.0 }
 0x14e   :  { %v2024_v44 = vpop.f32.mrf.mxu2 }
 0x14f   :  { %v2025_v46 = vadd.f32 %v2024_v44, %v2011_v43  ;;  %v2038_v47 = vpop.f32.mrf.mxu3 }
 0x151   :  { %v2039_v48 = vadd.f32 %v2038_v47, %v2025_v46 }
 0x153   :  { %v2042_v50 = vmax.f32 %v2039_v48, 0.0 }
 0x155   :  { %v2043_v51 = vpack.c.bf16 %v2042_v50, %v2041_v49 }
 0x157   :  { %2120 = vmatmul.bf16.vlgmr.msra.gmra.mxu0 %v2043_v51 }
 0x1d4   :  { %v2121_v53 = vpop.f32.mrf.mxu0 }
 0x1d5   :  { %v2122_v54 = vadd.f32 %v3270_v52, %v2121_v53 }
 0x1d7   :  { %2126 = vst [vmem:[#allocation2] sm:$0xff] %v2122_v54 }
 0x1dc   :  { %v2123_v55 = vpop.f32.mrf.mxu0 }
 0x1dd   :  { %v2124_v56 = vadd.f32 %v3270_v52, %v2123_v55 }
 0x1df   :  { %2127 = vst [vmem:[#allocation2 + $0x8] sm:$0xff] %v2124_v56 }
 0x1e0   :  { %2140 = dma.vmem_to_hbm [thread:$0]  %s2133_s15, 256, %s2135_s17, [#allocation3], %s3298_s18, %s3298_s18, %s3299_s19  }
 0x1e1   :  { %3295 = dma.done.wait [#allocation3], 256  }
 0x1e2   :  { %3296 = vsyncadd [#allocation3], 4294967040 }
 0x1e3   :  { %2145 = vsyncpa [#allocation3], 1 }

</bundles_post_ra>
